<compile_context>
chip_gen: v7x
topology: tpu7x:2x2x1
jax: 0.10.0
libtpu: 0.0.40
codegen_flags: <defaults>
</compile_context>

<pallas_src>
import numpy as np
import jax
import jax.numpy as jnp
from jax.experimental import pallas as pl
from jax.experimental.pallas import tpu as pltpu


# ----------------------------------------------------------------------------
# Constant construction (plain numpy; deterministic)
# ----------------------------------------------------------------------------
def _round_up(x, m):
    return (x + m - 1) // m * m


def make_windowed_dft(n_fft, n_freq_used):
    """Hann-windowed one-sided DFT as one (n_fft, 2*n_freq_used) bf16 matrix.

    Columns [0, K)   : win * cos(2*pi*n*k/N)   (real part),  K = n_fft//2
    Columns [K, 2K)  : win * -sin(2*pi*n*k/N)  (imag part)
    The Nyquist bin (k = n_fft//2) is dropped; its mel-filterbank row is all
    zeros for the default f_max = sr/2, so this is exact.
    """
    n = np.arange(n_fft, dtype=np.float64)
    k = np.arange(n_freq_used, dtype=np.float64)
    ang = 2.0 * np.pi * np.outer(n, k) / n_fft
    win = 0.5 - 0.5 * np.cos(2.0 * np.pi * n / n_fft)          # periodic Hann
    dft = np.concatenate([win[:, None] * np.cos(ang),
                          win[:, None] * (-np.sin(ang))], axis=1)
    return jnp.asarray(dft.astype(np.float32)).astype(jnp.bfloat16)


def make_mel_filterbank(sample_rate, n_fft, n_mels, n_freq_used, n_mels_pad):
    """torchaudio melscale_fbanks defaults (HTK, norm=None, f_min=0, f_max=sr/2),
    truncated to n_freq_used rows (Nyquist row is zero) and zero-padded to
    n_mels_pad lane-aligned columns."""
    n_freqs = n_fft // 2 + 1
    all_freqs = np.linspace(0.0, sample_rate / 2.0, n_freqs)
    hz_to_mel = lambda f: 2595.0 * np.log10(1.0 + f / 700.0)
    m_pts = np.linspace(hz_to_mel(0.0), hz_to_mel(sample_rate / 2.0), n_mels + 2)
    f_pts = 700.0 * (10.0 ** (m_pts / 2595.0) - 1.0)
    f_diff = f_pts[1:] - f_pts[:-1]
    slopes = f_pts[None, :] - all_freqs[:, None]                # (n_freqs, n_mels+2)
    down = (-slopes[:, :-2]) / f_diff[:-1]
    up = slopes[:, 2:] / f_diff[1:]
    fb = np.maximum(0.0, np.minimum(down, up))                  # (n_freqs, n_mels)
    out = np.zeros((n_freq_used, n_mels_pad), dtype=np.float32)
    out[:, :n_mels] = fb[:n_freq_used, :]
    return jnp.asarray(out)


# ----------------------------------------------------------------------------
# Fused Pallas kernel: chunked STFT + power + mel + log + pool + linear head
# ----------------------------------------------------------------------------
def make_kernel(F_pad, n_shift, hop, n_freq_used):
    two_k = 2 * n_freq_used

    def kernel(chunks_ref, dft_ref, fb_ref, pool_ref, w_ref, bias_ref, out_ref):
        # chunks_ref: (C, hop) f32   one batch element's hop-sized audio chunks
        # dft_ref   : (n_fft, 2K) bf16  window-folded [cos | -sin], Nyquist dropped
        # fb_ref    : (K, n_mels_pad) f32  mel filterbank, zero-padded columns
        # pool_ref  : (8, F_pad) f32   row 0 = 1/F over valid frames, else 0
        # w_ref     : (n_mels_pad, n_cls_pad) f32 ; bias_ref: (1, n_cls_pad) f32
        # out_ref   : (8, n_cls_pad) f32  row 0 holds this batch element's logits

        # Shifted-partial-matmul STFT: frame f = concat_j chunks[f+j], hence
        #   frames @ DFT == sum_j chunks[j : j+F_pad] @ DFT[j*hop : (j+1)*hop].
        spec = jnp.zeros((F_pad, two_k), jnp.float32)
        for j in range(n_shift):
            sub = chunks_ref[j:j + F_pad, :].astype(jnp.bfloat16)
            spec = spec + jnp.dot(sub, dft_ref[j * hop:(j + 1) * hop, :],
                                  preferred_element_type=jnp.float32)

        re = spec[:, :n_freq_used]
        im = spec[:, n_freq_used:]
        power = re * re + im * im                               # |STFT|^2

        mel = jnp.dot(power, fb_ref[...], preferred_element_type=jnp.float32)
        logmel = jnp.log(mel + 1e-9)                            # (F_pad, n_mels_pad)

        # TODO(synk): classifier_model is injected at construction time and its
        # architecture is unspecified; synthetic mean-pool-over-frames + linear
        # head.  The pool matmul keeps the reduction on the MXU and its zero
        # weights mask the padded frames.
        pooled = jnp.dot(pool_ref[...], logmel,
                         preferred_element_type=jnp.float32)    # (8, n_mels_pad)
        out_ref[...] = (jnp.dot(pooled, w_ref[...],
                                preferred_element_type=jnp.float32)
                        + bias_ref[...])

    return kernel


# ----------------------------------------------------------------------------
# Forward pass
# ----------------------------------------------------------------------------
def audio_to_breath_classifier(audio, clf_w, clf_b, *, sample_rate, n_fft,
                               hop_length, n_mels):
    B, T = audio.shape
    hop = hop_length
    assert n_fft % hop == 0, "kernel assumes hop_length divides n_fft"
    n_shift = n_fft // hop
    n_freq_used = n_fft // 2                      # Nyquist dropped (fb row is 0)
    F = 1 + T // hop                              # torch.stft center=True frames
    F_pad = _round_up(F, 8)                       # sublane-aligned frame count
    C = F_pad + n_shift - 1                       # hop-chunks needed per batch
    n_mels_pad = _round_up(n_mels, 128)
    n_classes = clf_w.shape[1]
    n_cls_pad = _round_up(n_classes, 128)

    # center=True, pad_mode="reflect" framing, then view as hop-sized chunks.
    pad = n_fft // 2
    padded = jnp.pad(audio, ((0, 0), (pad, pad)), mode="reflect")  # (B, T+n_fft)
    L = C * hop
    if L >= padded.shape[1]:
        padded = jnp.pad(padded, ((0, 0), (0, L - padded.shape[1])))
    else:
        padded = padded[:, :L]                    # tail unused by the first F frames
    chunks = padded.reshape(B, C, hop)            # (B, C, hop) f32

    dft = make_windowed_dft(n_fft, n_freq_used)                      # (n_fft, 2K) bf16
    fb = make_mel_filterbank(sample_rate, n_fft, n_mels,
                             n_freq_used, n_mels_pad)                # (K, n_mels_pad)

    pool = np.zeros((8, F_pad), dtype=np.float32)
    pool[0, :F] = 1.0 / F                         # mean over the F valid frames
    pool = jnp.asarray(pool)

    w_pad = jnp.zeros((n_mels_pad, n_cls_pad), jnp.float32)
    w_pad = w_pad.at[:n_mels, :n_classes].set(clf_w)
    b_pad = jnp.zeros((1, n_cls_pad), jnp.float32)
    b_pad = b_pad.at[:, :n_classes].set(clf_b.reshape(1, -1))

    kernel = make_kernel(F_pad, n_shift, hop, n_freq_used)

    flops = B * (2 * F_pad * n_fft * 2 * n_freq_used
                 + 2 * F_pad * n_freq_used * n_mels_pad
                 + 2 * 8 * F_pad * n_mels_pad
                 + 2 * 8 * n_mels_pad * n_cls_pad)
    bytes_accessed = (chunks.size * 4 + dft.size * 2 + fb.size * 4
                      + pool.size * 4 + w_pad.size * 4 + b_pad.size * 4
                      + B * 8 * n_cls_pad * 4)

    out = pl.pallas_call(
        kernel,
        out_shape=jax.ShapeDtypeStruct((B, 8, n_cls_pad), jnp.float32),
        grid=(B,),
        in_specs=[
            pl.BlockSpec((None, C, hop), lambda b: (b, 0, 0)),          # audio chunks
            pl.BlockSpec((n_fft, 2 * n_freq_used), lambda b: (0, 0)),   # DFT (resident)
            pl.BlockSpec((n_freq_used, n_mels_pad), lambda b: (0, 0)),  # filterbank
            pl.BlockSpec((8, F_pad), lambda b: (0, 0)),                 # pool weights
            pl.BlockSpec((n_mels_pad, n_cls_pad), lambda b: (0, 0)),    # head W
            pl.BlockSpec((1, n_cls_pad), lambda b: (0, 0)),             # head bias
        ],
        out_specs=pl.BlockSpec((None, 8, n_cls_pad), lambda b: (b, 0, 0)),
        compiler_params=pltpu.CompilerParams(
            dimension_semantics=("parallel",)),
        cost_estimate=pl.CostEstimate(
            flops=flops,
            transcendentals=B * F_pad * n_mels_pad,
            bytes_accessed=bytes_accessed),
    )(chunks, dft, fb, pool, w_pad, b_pad)

    # TODO(synk): for very long audio (thousands of frames) tile the frame axis
    # with an "arbitrary" grid dimension and accumulate the pooled sum in VMEM
    # scratch instead of keeping the whole spectrogram resident.
    return out[:, 0, :n_classes]


# ----------------------------------------------------------------------------
if __name__ == "__main__":
    # Small shapes consistent with the forward pass.
    B, T = 2, 1024
    sample_rate, n_fft, hop_length, n_mels = 8000, 256, 64, 32
    n_classes = 4

    key = jax.random.PRNGKey(0)
    k_audio, k_w = jax.random.split(key)
    audio = jax.random.normal(k_audio, (B, T), dtype=jnp.float32)
    clf_w = 0.02 * jax.random.normal(k_w, (n_mels, n_classes), dtype=jnp.float32)
    clf_b = jnp.zeros((1, n_classes), dtype=jnp.float32)

    logits = audio_to_breath_classifier(
        audio, clf_w, clf_b,
        sample_rate=sample_rate, n_fft=n_fft,
        hop_length=hop_length, n_mels=n_mels,
    )
    logits = jax.block_until_ready(logits)

    assert logits.shape == (B, n_classes)
    assert bool(jnp.all(jnp.isfinite(logits)))
    print("KERNEL_OK")
</pallas_src>

<mosaic_0001>
module attributes {stable_mosaic.version = 11 : i64} {
  func.func @kernel(%arg0: i32, %arg1: memref<1x27x64xf32, #tpu.memory_space<vmem>>, %arg2: memref<256x256xbf16, #tpu.memory_space<vmem>>, %arg3: memref<128x128xf32, #tpu.memory_space<vmem>>, %arg4: memref<8x24xf32, #tpu.memory_space<vmem>>, %arg5: memref<128x128xf32, #tpu.memory_space<vmem>>, %arg6: memref<1x128xf32, #tpu.memory_space<vmem>>, %arg7: memref<1x8x128xf32, #tpu.memory_space<vmem>>) attributes {dimension_semantics = [#tpu.dimension_semantics<parallel>], iteration_bounds = array<i64: 2>, scalar_prefetch = 0 : i64, scratch_operands = 0 : i64, tpu.core_type = #tpu.core_type<tc>, window_params = [{transform_indices = @transform_0, window_bounds = array<i64: 1, 27, 64>}, {pipeline_mode = #tpu.pipeline_mode<synchronous>, transform_indices = @transform_1, window_bounds = array<i64: 256, 256>}, {pipeline_mode = #tpu.pipeline_mode<synchronous>, transform_indices = @transform_2, window_bounds = array<i64: 128, 128>}, {pipeline_mode = #tpu.pipeline_mode<synchronous>, transform_indices = @transform_3, window_bounds = array<i64: 8, 24>}, {pipeline_mode = #tpu.pipeline_mode<synchronous>, transform_indices = @transform_4, window_bounds = array<i64: 128, 128>}, {pipeline_mode = #tpu.pipeline_mode<synchronous>, transform_indices = @transform_5, window_bounds = array<i64: 1, 128>}, {transform_indices = @transform_6, window_bounds = array<i64: 1, 8, 128>}]} {
    %cst = arith.constant 0.000000e+00 : f32
    %0 = vector.broadcast %cst : f32 to vector<24x256xf32>
    %c0 = arith.constant 0 : index
    %c0_0 = arith.constant 0 : index
    %c0_1 = arith.constant 0 : index
    %1 = vector.load %arg1[%c0, %c0_0, %c0_1] : memref<1x27x64xf32, #tpu.memory_space<vmem>>, vector<1x24x64xf32>
    %2 = vector.shape_cast %1 : vector<1x24x64xf32> to vector<24x64xf32>
    %3 = arith.truncf %2 : vector<24x64xf32> to vector<24x64xbf16>
    %c0_2 = arith.constant 0 : index
    %c0_3 = arith.constant 0 : index
    %4 = vector.load %arg2[%c0_2, %c0_3] : memref<256x256xbf16, #tpu.memory_space<vmem>>, vector<64x256xbf16>
    %cst_4 = arith.constant dense<0.000000e+00> : vector<24x256xf32>
    %5 = tpu.matmul %3, %4, %cst_4 {dimension_numbers = #tpu.dot_dimension_numbers<[1], [0], [0], [1], [0, 0, 1, 1], [], []>} : vector<24x64xbf16>, vector<64x256xbf16>, vector<24x256xf32> -> vector<24x256xf32>
    %6 = arith.addf %0, %5 : vector<24x256xf32>
    %c0_5 = arith.constant 0 : index
    %c1 = arith.constant 1 : index
    %c0_6 = arith.constant 0 : index
    %7 = vector.load %arg1[%c0_5, %c1, %c0_6] : memref<1x27x64xf32, #tpu.memory_space<vmem>>, vector<1x24x64xf32>
    %8 = vector.shape_cast %7 : vector<1x24x64xf32> to vector<24x64xf32>
    %9 = arith.truncf %8 : vector<24x64xf32> to vector<24x64xbf16>
    %c64 = arith.constant 64 : index
    %c0_7 = arith.constant 0 : index
    %10 = vector.load %arg2[%c64, %c0_7] : memref<256x256xbf16, #tpu.memory_space<vmem>>, vector<64x256xbf16>
    %cst_8 = arith.constant dense<0.000000e+00> : vector<24x256xf32>
    %11 = tpu.matmul %9, %10, %cst_8 {dimension_numbers = #tpu.dot_dimension_numbers<[1], [0], [0], [1], [0, 0, 1, 1], [], []>} : vector<24x64xbf16>, vector<64x256xbf16>, vector<24x256xf32> -> vector<24x256xf32>
    %12 = arith.addf %6, %11 : vector<24x256xf32>
    %c0_9 = arith.constant 0 : index
    %c2 = arith.constant 2 : index
    %c0_10 = arith.constant 0 : index
    %13 = vector.load %arg1[%c0_9, %c2, %c0_10] : memref<1x27x64xf32, #tpu.memory_space<vmem>>, vector<1x24x64xf32>
    %14 = vector.shape_cast %13 : vector<1x24x64xf32> to vector<24x64xf32>
    %15 = arith.truncf %14 : vector<24x64xf32> to vector<24x64xbf16>
    %c128 = arith.constant 128 : index
    %c0_11 = arith.constant 0 : index
    %16 = vector.load %arg2[%c128, %c0_11] : memref<256x256xbf16, #tpu.memory_space<vmem>>, vector<64x256xbf16>
    %cst_12 = arith.constant dense<0.000000e+00> : vector<24x256xf32>
    %17 = tpu.matmul %15, %16, %cst_12 {dimension_numbers = #tpu.dot_dimension_numbers<[1], [0], [0], [1], [0, 0, 1, 1], [], []>} : vector<24x64xbf16>, vector<64x256xbf16>, vector<24x256xf32> -> vector<24x256xf32>
    %18 = arith.addf %12, %17 : vector<24x256xf32>
    %c0_13 = arith.constant 0 : index
    %c3 = arith.constant 3 : index
    %c0_14 = arith.constant 0 : index
    %19 = vector.load %arg1[%c0_13, %c3, %c0_14] : memref<1x27x64xf32, #tpu.memory_space<vmem>>, vector<1x24x64xf32>
    %20 = vector.shape_cast %19 : vector<1x24x64xf32> to vector<24x64xf32>
    %21 = arith.truncf %20 : vector<24x64xf32> to vector<24x64xbf16>
    %c192 = arith.constant 192 : index
    %c0_15 = arith.constant 0 : index
    %22 = vector.load %arg2[%c192, %c0_15] : memref<256x256xbf16, #tpu.memory_space<vmem>>, vector<64x256xbf16>
    %cst_16 = arith.constant dense<0.000000e+00> : vector<24x256xf32>
    %23 = tpu.matmul %21, %22, %cst_16 {dimension_numbers = #tpu.dot_dimension_numbers<[1], [0], [0], [1], [0, 0, 1, 1], [], []>} : vector<24x64xbf16>, vector<64x256xbf16>, vector<24x256xf32> -> vector<24x256xf32>
    %24 = arith.addf %18, %23 : vector<24x256xf32>
    %25 = vector.extract_strided_slice %24 {offsets = [0, 0], sizes = [24, 128], strides = [1, 1]} : vector<24x256xf32> to vector<24x128xf32>
    %26 = vector.extract_strided_slice %24 {offsets = [0, 128], sizes = [24, 128], strides = [1, 1]} : vector<24x256xf32> to vector<24x128xf32>
    %27 = arith.mulf %25, %25 : vector<24x128xf32>
    %28 = arith.mulf %26, %26 : vector<24x128xf32>
    %29 = arith.addf %27, %28 : vector<24x128xf32>
    %c0_17 = arith.constant 0 : index
    %c0_18 = arith.constant 0 : index
    %30 = vector.load %arg3[%c0_17, %c0_18] : memref<128x128xf32, #tpu.memory_space<vmem>>, vector<128x128xf32>
    %cst_19 = arith.constant dense<0.000000e+00> : vector<24x128xf32>
    %31 = tpu.matmul %29, %30, %cst_19 {dimension_numbers = #tpu.dot_dimension_numbers<[1], [0], [0], [1], [0, 0, 1, 1], [], []>} : vector<24x128xf32>, vector<128x128xf32>, vector<24x128xf32> -> vector<24x128xf32>
    %cst_20 = arith.constant 9.99999971E-10 : f32
    %32 = vector.broadcast %cst_20 : f32 to vector<24x128xf32>
    %33 = arith.addf %31, %32 : vector<24x128xf32>
    %34 = math.log %33 : vector<24x128xf32>
    %c0_21 = arith.constant 0 : index
    %c0_22 = arith.constant 0 : index
    %35 = vector.load %arg4[%c0_21, %c0_22] : memref<8x24xf32, #tpu.memory_space<vmem>>, vector<8x24xf32>
    %cst_23 = arith.constant dense<0.000000e+00> : vector<8x128xf32>
    %36 = tpu.matmul %35, %34, %cst_23 {dimension_numbers = #tpu.dot_dimension_numbers<[1], [0], [0], [1], [0, 0, 1, 1], [], []>} : vector<8x24xf32>, vector<24x128xf32>, vector<8x128xf32> -> vector<8x128xf32>
    %c0_24 = arith.constant 0 : index
    %c0_25 = arith.constant 0 : index
    %37 = vector.load %arg5[%c0_24, %c0_25] : memref<128x128xf32, #tpu.memory_space<vmem>>, vector<128x128xf32>
    %cst_26 = arith.constant dense<0.000000e+00> : vector<8x128xf32>
    %38 = tpu.matmul %36, %37, %cst_26 {dimension_numbers = #tpu.dot_dimension_numbers<[1], [0], [0], [1], [0, 0, 1, 1], [], []>} : vector<8x128xf32>, vector<128x128xf32>, vector<8x128xf32> -> vector<8x128xf32>
    %c0_27 = arith.constant 0 : index
    %c0_28 = arith.constant 0 : index
    %39 = vector.load %arg6[%c0_27, %c0_28] : memref<1x128xf32, #tpu.memory_space<vmem>>, vector<1x128xf32>
    %40 = vector.broadcast %39 : vector<1x128xf32> to vector<8x128xf32>
    %41 = arith.addf %38, %40 : vector<8x128xf32>
    %c0_29 = arith.constant 0 : index
    %c0_30 = arith.constant 0 : index
    %c0_31 = arith.constant 0 : index
    %42 = vector.load %arg7[%c0_29, %c0_30, %c0_31] : memref<1x8x128xf32, #tpu.memory_space<vmem>>, vector<1x8x128xf32>
    %43 = vector.shape_cast %42 : vector<1x8x128xf32> to vector<8x128xf32>
    %44 = vector.shape_cast %41 : vector<8x128xf32> to vector<1x8x128xf32>
    tpu.vector_store %arg7[%c0_29, %c0_30, %c0_31], %44 {strides = array<i32>} : memref<1x8x128xf32, #tpu.memory_space<vmem>>, vector<1x8x128xf32>,
    return
  }
  func.func @transform_0(%arg0: i32) -> (i32, i32, i32) {
    %c0_i32 = arith.constant 0 : i32
    %c0_i32_0 = arith.constant 0 : i32
    %c0_i32_1 = arith.constant 0 : i32
    return %arg0, %c0_i32, %c0_i32_0 : i32, i32, i32
  }
  func.func @transform_1(%arg0: i32) -> (i32, i32) {
    %c0_i32 = arith.constant 0 : i32
    %c0_i32_0 = arith.constant 0 : i32
    %c0_i32_1 = arith.constant 0 : i32
    return %c0_i32, %c0_i32_0 : i32, i32
  }
  func.func @transform_2(%arg0: i32) -> (i32, i32) {
    %c0_i32 = arith.constant 0 : i32
    %c0_i32_0 = arith.constant 0 : i32
    %c0_i32_1 = arith.constant 0 : i32
    return %c0_i32, %c0_i32_0 : i32, i32
  }
  func.func @transform_3(%arg0: i32) -> (i32, i32) {
    %c0_i32 = arith.constant 0 : i32
    %c0_i32_0 = arith.constant 0 : i32
    %c0_i32_1 = arith.constant 0 : i32
    return %c0_i32, %c0_i32_0 : i32, i32
  }
  func.func @transform_4(%arg0: i32) -> (i32, i32) {
    %c0_i32 = arith.constant 0 : i32
    %c0_i32_0 = arith.constant 0 : i32
    %c0_i32_1 = arith.constant 0 : i32
    return %c0_i32, %c0_i32_0 : i32, i32
  }
  func.func @transform_5(%arg0: i32) -> (i32, i32) {
    %c0_i32 = arith.constant 0 : i32
    %c0_i32_0 = arith.constant 0 : i32
    %c0_i32_1 = arith.constant 0 : i32
    return %c0_i32, %c0_i32_0 : i32, i32
  }
  func.func @transform_6(%arg0: i32) -> (i32, i32, i32) {
    %c0_i32 = arith.constant 0 : i32
    %c0_i32_0 = arith.constant 0 : i32
    %c0_i32_1 = arith.constant 0 : i32
    return %arg0, %c0_i32, %c0_i32_0 : i32, i32, i32
  }
}

</mosaic_0001>

<bundles_post_ra>
// kernel: tpu_custom_call.1
= control target key start
LH: loop header
LB: loop body
LE: loop exit
PB: predicated region body
PF: predicated region fallthrough
CT: control target
= control target key end

     0   :  { %11 = vsyncpa [#allocation3], 0  ;;  %s2024_s0 = inlined_call_operand.vmem [shape: f32[2,27,64], index: 0, kind: input, shape index: {}]   ;;  %s2025_s1 = inlined_call_operand.hbm [shape: bf16[256,256], index: 1, kind: input, shape index: {}]   ;;  %s2026_s2 = inlined_call_operand.hbm [shape: f32[128,128], index: 2, kind: input, shape index: {}]   ;;  %s2027_s3 = inlined_call_operand.hbm [shape: f32[8,24], index: 3, kind: input, shape index: {}]   ;;  %s2028_s4 = inlined_call_operand.vmem [shape: f32[128,128], index: 4, kind: input, shape index: {}]   ;;  %s2029_s5 = inlined_call_operand.vmem [shape: f32[1,128], index: 5, kind: input, shape index: {}]   ;;  %s2030_s6 = inlined_call_operand.hbm [shape: f32[2,8,128], index: 6, kind: output, shape index: {}]  }
   0x1   :  { %12 = vsyncpa [#allocation6], 0 }
   0x2   :  { %13 = vsyncpa [#allocation4], 0 }
   0x3   :  { %15 = vsyncpa [#allocation4 + $0x1], 0  ;;  %s1721_s21 = smov 0   ;;  %s1723_s22 = smov 0  }
   0x4   :  { %s1725_s23 = smov 0   ;;  %s1727_s24 = smov 0  }
   0x5 LB: > { %2035 = sst [smem:[#allocation12_spill]] %s1670_s23  ;;  %s1742_s25 = sadd.s32 4294967295, %s1674_s24   ;;  %s1674_s24 = sphi %s1727_s24, %s2053_s24   ;;  %s1670_s23 = sphi %s1725_s23, %s2050_s23   ;;  %s1666_s22 = sphi %s1723_s22, %s2052_s22   ;;  %s1662_s21 = sphi %s1721_s21, %s2051_s21  }
   0x6   : > { %s1130_s26 = sadd.s32 4294967294, %s1674_s24   ;;  %s1746_s27 = sadd.s32 1, %s1674_s24  }
   0x7   : > { %s159_s28 = sadd.s32 1, %s1670_s23  ;;  %s156_s29 = ssub.s32 %s1674_s24, %s1746_s27 }
   0x8   : > { %p169_p0 = scmp.ne.s32.totalorder %s1670_s23, %s1666_s22  ;;  %p157_p1 = scmp.eq.s32.totalorder %s156_s29, 0 }
   0x9   : > { %p170_p2 = scmp.eq.s32.totalorder %s1742_s25, 1  ;;  %p175_p3 = scmp.ne.s32.totalorder %s1666_s22, %s1662_s21 }
   0xa   : > { %p176_p4 = scmp.eq.s32.totalorder %s1130_s26, 1  ;;  %p1131_p7 = scmp.ge.s32.totalorder %s1674_s24, 1 }
   0xb   : > { %s1757_s30 = scalar_select %p157_p1, %s1670_s23, %s159_s28  }
   0xc   : > { %p1759_p5 = por %p170_p2, %p169_p0  ;;  %p1763_p6 = por %p176_p4, %p175_p3 }
   0xd   : > { %2036 = sst [smem:[#allocation13_spill]] %s1757_s30  ;;  %p183_p8 = scmp.lt.s32.totalorder %s1674_s24, 3 }
   0xe   : > { %s2037_s7 = scalar_select %p1759_p5, 1, 0 }
   0xf   : > { %s2038_s8 = scalar_select %p1763_p6, 1, 0 }
  0x10   : > { %p2031_p9 = scmp.eq.s32.totalorder %s1742_s25, 0  ;;  %p1770_p10 = pnand %p1131_p7, %p183_p8 }
  0x11   : > { %s1676_s10 = smov [#allocation5]   ;;  %s1677_s13 = smov [#allocation2]  }
  0x12   : > { %s2039_s9 = scalar_select %p1770_p10, 1, 0 }
  0x13   : > { %p1404_p11 = pneg %p1770_p10  ;;  %s208_s11 = sshll.u32 %s1676_s10, 4  ;;  %s1776_s11 = int_to_ptr.vmem [resolvable:$true] %s208_s11 }
  0x14   : > { %s195_s14 = sshll.u32 %s1677_s13, 4  ;;  %s1678_s15 = smov [#allocation7]   ;;  %s1784_s14 = int_to_ptr.vmem [resolvable:$true] %s195_s14 }
  0x15   : > { %p1780_p12 = pnand %p2031_p9, %p1404_p11  ;;  %s1786_s16 = sshll.u32 %s1678_s15, 4  ;;  %s223_s16 = int_to_ptr.vmem [resolvable:$true] %s1786_s16 }
  0x16   : > { %s1520_s19 = scalar_lea.hbm %s2026_s2, 2048 }
  0x17   : > { %p1521_p13 = scmp.ne.s32.totalorder %s2026_s2, %s1520_s19  ;;  %p1796_p0 = pneg %p1780_p12 }
  0x18   : > { %p1527_p3 = scmp.lt.u32.totalorder %s1520_s19, %s2026_s2 }
  0x19   : > { %p1523_p1 = pnand %p1796_p0, %p1521_p13 }
  0x1b   : > { %p1524_p2 = pneg %p1523_p1 }
  0x1d   : > { %p1529_p4 = pnand %p1527_p3, %p1524_p2 }
  0x1f   : > { %1532 = shalt.err (!%p1529_p4)
}
  0x20   : > { %s1533_s13 = scalar_lea.vmem %s1776_s11, 2048  ;;  %p1541_p9 = scmp.lt.s32.totalorder %s1776_s11, %s1776_s11 }
  0x21   : > { %p1534_p7 = scmp.ne.s32.totalorder %s1776_s11, %s1533_s13  ;;  %p1542_p6 = scmp.lt.s32.totalorder %s1533_s13, %s1533_s13 }
  0x23   : > { %p1536_p8 = pnand %p1534_p7, %p1796_p0  ;;  %p1543_p13 = por %p1542_p6, %p1541_p9 }
  0x25   : > { %p1537_p11 = pneg %p1536_p8 }
  0x27   : > { %p1544_p1 = pnand %p1543_p13, %p1537_p11 }
  0x29   : > { %1547 = shalt.err (!%p1544_p1)
}
  0x2a   : > { %s1679_s15 = smov 128   ;;  %s1680_s17 = smov 8  }
  0x2b   : > { %1410 = dma.hbm_to_vmem [thread:$0]  (!%p1780_p12), %s2026_s2, 2048, %s1776_s11, [#allocation6], %s1679_s15, %s1679_s15, %s1680_s17  }
  0x2c   : > { %s1548_s29 = scalar_lea.hbm %s2025_s1, 4096 }
  0x2d   : > { %p1549_p6 = scmp.ne.s32.totalorder %s2025_s1, %s1548_s29  ;;  %p1555_p3 = scmp.lt.u32.totalorder %s1548_s29, %s2025_s1 }
  0x2f   : > { %p1551_p9 = pnand %p1549_p6, %p1796_p0 }
  0x31   : > { %p1552_p2 = pneg %p1551_p9 }
  0x33   : > { %p1557_p4 = pnand %p1555_p3, %p1552_p2 }
  0x35   : > { %1560 = shalt.err (!%p1557_p4)
}
  0x36   : > { %s1561_s11 = scalar_lea.vmem %s1784_s14, 4096  ;;  %p1569_p13 = scmp.lt.s32.totalorder %s1784_s14, %s1784_s14 }
  0x37   : > { %p1562_p7 = scmp.ne.s32.totalorder %s1784_s14, %s1561_s11  ;;  %p1570_p1 = scmp.lt.s32.totalorder %s1561_s11, %s1561_s11 }
  0x39   : > { %p1564_p8 = pnand %p1562_p7, %p1796_p0  ;;  %p1571_p6 = por %p1570_p1, %p1569_p13 }
  0x3b   : > { %p1565_p11 = pneg %p1564_p8 }
  0x3d   : > { %p1572_p9 = pnand %p1571_p6, %p1565_p11 }
  0x3f   : > { %1575 = shalt.err (!%p1572_p9)
}
  0x40   : > { %1407 = dma.hbm_to_vmem [thread:$0]  (!%p1780_p12), %s2025_s1, 4096, %s1784_s14, [#allocation3], %s1679_s15, %s1679_s15, %s1680_s17  }
  0x41   : > { %s1576_s20 = scalar_lea.hbm %s2027_s3, 128 }
  0x42   : > { %p1577_p2 = scmp.ne.s32.totalorder %s2027_s3, %s1576_s20  ;;  %p1583_p7 = scmp.lt.u32.totalorder %s1576_s20, %s2027_s3 }
  0x44   : > { %p1579_p3 = pnand %p1577_p2, %p1796_p0 }
  0x46   : > { %p1580_p4 = pneg %p1579_p3 }
  0x48   : > { %p1585_p8 = pnand %p1583_p7, %p1580_p4 }
  0x4a   : > { %1588 = shalt.err (!%p1585_p8)
}
  0x4b   : > { %s1589_s11 = scalar_lea.vmem %s223_s16, 128  ;;  %p1597_p6 = scmp.lt.s32.totalorder %s223_s16, %s223_s16 }
  0x4c   : > { %p1590_p11 = scmp.ne.s32.totalorder %s223_s16, %s1589_s11  ;;  %p1598_p9 = scmp.lt.s32.totalorder %s1589_s11, %s1589_s11 }
  0x4e   : > { %p1592_p13 = pnand %p1590_p11, %p1796_p0  ;;  %p1599_p5 = por %p1598_p9, %p1597_p6 }
  0x50   : > { %p1593_p1 = pneg %p1592_p13 }
  0x52   : > { %p1600_p10 = pnand %p1599_p5, %p1593_p1 }
  0x54   : > { %1603 = shalt.err (!%p1600_p10)
}
  0x55   : > { %1413 = dma.hbm_to_vmem [thread:$0]  (!%p1780_p12), %s2027_s3, 128, %s223_s16, [#allocation6]  }
  0x56   : > { %p2042_p2 = scmp.ne.s32.totalorder %s2039_s9, 0 }
  0x57   : > { %p2043_p3 = scmp.eq.s32.totalorder (!%p2042_p2), %s1742_s25, 0 }
  0x58   : > { %249 = sbr.rel (%p2042_p2) target bundleno = 1061 (0x425), region = 44 }
  0x5f   : > { %1649 = dma.done.wait (%p2043_p3), [#allocation3], 4096   ;;  %p2044_p0 = pmov %p2043_p3 }
  0x61   : > { %1651 = vsyncadd (%p2044_p0), [#allocation3], 4294963200  ;;  %p2045_p4 = pmov %p2044_p0 }
  0x62   : > { %p2046_p5 = pmov %p2044_p0 }
  0x63   : > { %1653 = dma.done.wait (%p2045_p4), [#allocation6], 2176  }
  0x64   : > { %1655 = vsyncadd (%p2046_p5), [#allocation6], 4294965120  ;;  %v1681_v0 = vmov 0   ;;  %v1682_v1 = vmov 0.0|0.0   ;;  %p287_p10 = scmp.lt.s32.totalorder %s1742_s25, 1  ;;  %vm359_vm0 = vcmask 523264  }
  0x65   : > { %398 = vmatprep.mubr.bf16.mxu0 %v1681_v0  ;;  %1315 = vmatprep.subr.bf16.mxu1 %v1682_v1  ;;  %v1466_v2 = vld [vmem:[#allocation2 + $0x44] ss:$8 sps:$4 sm:$0xff]   ;;  %v1468_v3 = vld [vmem:[#allocation2 + $0x40] ss:$8 sps:$4 sm:$0xff]   ;;  %v1469_v4 = vld [vmem:[#allocation2 + $0x54] ss:$8 sps:$4 sm:$0xff]  }
  0x66   : > { %s288_s9 = scalar_select %p287_p10, %s1742_s25, 1  ;;  %366 = vmatprep.subr.bf16.mxu0 %v1466_v2  ;;  %v1471_v5 = vld [vmem:[#allocation2 + $0x50] ss:$8 sps:$4 sm:$0xff]   ;;  %v1472_v6 = vld [vmem:[#allocation2 + $0x64] ss:$8 sps:$4 sm:$0xff]   ;;  %vm1683_vm1 = vmmov 0  }
  0x67   : > { %367 = vmatpush1.bf16.msra.mxu0 %v1468_v3  ;;  %v1474_v7 = vld [vmem:[#allocation2 + $0x60] ss:$8 sps:$4 sm:$0xff]   ;;  %v1475_v8 = vld [vmem:[#allocation2 + $0x74] ss:$8 sps:$4 sm:$0xff]   ;;  %v1477_v9 = vld [vmem:[#allocation2 + $0x70] ss:$8 sps:$4 sm:$0xff]  }
  0x68   : > { %368 = vmatprep.subr.bf16.mxu0 %v1469_v4  ;;  %s1189_s12 = sshll.u32 %s288_s9, 5  ;;  %v1480_v12 = vld [vmem:[#allocation2 + $0x4] ss:$8 sps:$4 sm:$0xff]   ;;  %v1478_v14 = vld [vmem:[#allocation2] ss:$8 sps:$4 sm:$0xff]   ;;  %v757_v25 = vld [vmem:[#allocation5 + $0x10] sm:$0xff] }
  0x69   : > { %s1876_s17 = scalar_lea.vmem %s2024_s0, %s1189_s12  ;;  %v1483_v15 = vld [vmem:[#allocation2 + $0x14] ss:$8 sps:$4 sm:$0xff]   ;;  %v1481_v16 = vld [vmem:[#allocation2 + $0x10] ss:$8 sps:$4 sm:$0xff]   ;;  %v1486_v18 = vld [vmem:[#allocation2 + $0x24] ss:$8 sps:$4 sm:$0xff]  }
  0x6a   : > { %v306_v10 = vld [vmem:[%s1876_s17 + $0x1] sm:$0xff]  ;;  %v307_v11 = vld [vmem:[%s1876_s17 + $0x9] sm:$0xff]  ;;  %v308_v17 = vld [vmem:[%s1876_s17 + $0x11] sm:$0xff]  ;;  %vm858_vm2 = vcmask 195584   ;;  %s284_s28 = sand.u32 1, %s1666_s22   ;;  %s1186_s18 = sshll.u32 %s1742_s25, 7 }
  0x6b   : > { %369 = vmatpush1.bf16.msra.mxu0 %v1471_v5  ;;  %v309_v13 = vpack.c.bf16 %v307_v11, %v306_v10  ;;  %v310_v19 = vpack.c.bf16 %v308_v17, %v308_v17  ;;  %v1484_v20 = vld [vmem:[#allocation2 + $0x20] ss:$8 sps:$4 sm:$0xff]   ;;  %v1489_v21 = vld [vmem:[#allocation2 + $0x34] ss:$8 sps:$4 sm:$0xff]   ;;  %v1487_v27 = vld [vmem:[#allocation2 + $0x30] ss:$8 sps:$4 sm:$0xff]   ;;  %s1982_s10 = scalar_lea.hbm %s2030_s6, %s1186_s18 }
  0x6c   : > { %370 = vmatprep.subr.bf16.mxu0 %v1472_v6  ;;  %v755_v22 = vld [vmem:[#allocation5] sm:$0xff]  ;;  %v756_v23 = vld [vmem:[#allocation5 + $0x8] sm:$0xff]  ;;  %v758_v26 = vld [vmem:[#allocation5 + $0x18] sm:$0xff]  ;;  %s1027_s13 = scalar_lea.sflag [#allocation4], %s284_s28  ;;  %p2047_p7 = scmp.ne.s32.totalorder %s2037_s7, 0 }
  0x6d   : > { %v1316_v24 = vpack.c.bf16 %v756_v23, %v755_v22  ;;  %v293_v28 = vld [vmem:[%s1876_s17] sm:$0xff]  ;;  %v294_v29 = vld [vmem:[%s1876_s17 + $0x8] sm:$0xff]  ;;  %v1319_v31 = vpack.c.bf16 %v758_v26, %v757_v25  ;;  %v1495_v36 = vld [vmem:[#allocation2 + $0x94] ss:$8 sps:$4 sm:$0xff]   ;;  %s1685_s25 = smov [#allocation8]  }
  0x6e   : > { %v1492_v30 = vld [vmem:[#allocation2 + $0x84] ss:$8 sps:$4 sm:$0xff]   ;;  %v296_v34 = vpack.c.bf16 %v294_v29, %v293_v28  ;;  %v1490_v35 = vld [vmem:[#allocation2 + $0x80] ss:$8 sps:$4 sm:$0xff]   ;;  %v761_v38 = vld [vmem:[#allocation5 + $0x30] sm:$0xff]  ;;  %s1608_s14 = sshll.u32 %s1685_s25, 4  ;;  %s1609_s14 = int_to_ptr.vmem [resolvable:$false] %s1608_s14 }
  0x6f   : > { %371 = vmatpush1.bf16.msra.mxu0 %v1474_v7  ;;  %1317 = vmatpush3.bf16.msra.mxu1 %v1316_v24  ;;  %v759_v32 = vld [vmem:[#allocation5 + $0x20] sm:$0xff]  ;;  %v760_v33 = vld [vmem:[#allocation5 + $0x28] sm:$0xff]  ;;  %v762_v39 = vld [vmem:[#allocation5 + $0x38] sm:$0xff]  ;;  %s1610_s15 = scalar_lea.vmem %s1609_s14, 256 }
  0x70   : > { %372 = vmatprep.subr.bf16.mxu0 %v1475_v8  ;;  %1318 = vmatprep.subr.bf16.mxu1 %v1682_v1  ;;  %v1322_v37 = vpack.c.bf16 %v760_v33, %v759_v32  ;;  %v1493_v40 = vld [vmem:[#allocation2 + $0x90] ss:$8 sps:$4 sm:$0xff]   ;;  %v1498_v42 = vld [vmem:[#allocation2 + $0xa4] ss:$8 sps:$4 sm:$0xff]   ;;  %v1325_v43 = vpack.c.bf16 %v762_v39, %v761_v38  ;;  %v1496_v47 = vld [vmem:[#allocation2 + $0xa0] ss:$8 sps:$4 sm:$0xff]  }
  0x71   : > { %v295_v41 = vld [vmem:[%s1876_s17 + $0x10] sm:$0xff]  ;;  %v763_v44 = vld [vmem:[#allocation5 + $0x40] sm:$0xff]  ;;  %v764_v45 = vld [vmem:[#allocation5 + $0x48] sm:$0xff] }
  0x72   : > { %v297_v46 = vpack.c.bf16 %v295_v41, %v295_v41  ;;  %v1501_v48 = vld [vmem:[#allocation2 + $0xb4] ss:$8 sps:$4 sm:$0xff]   ;;  %v1328_v49 = vpack.c.bf16 %v764_v45, %v763_v44  ;;  %v1499_v52 = vld [vmem:[#allocation2 + $0xb0] ss:$8 sps:$4 sm:$0xff]   ;;  %v514_v53 = vld [vmem:[%s1876_s17 + $0x2] sm:$0xff] }
  0x73   : > { %373 = vmatpush1.bf16.msra.mxu0 %v1477_v9  ;;  %1320 = vmatpush3.bf16.msra.mxu1 %v1319_v31  ;;  %v765_v50 = vld [vmem:[#allocation5 + $0x50] sm:$0xff]  ;;  %v766_v51 = vld [vmem:[#allocation5 + $0x58] sm:$0xff]  ;;  %v1504_v55 = vld [vmem:[#allocation2 + $0xc4] ss:$8 sps:$4 sm:$0xff]  }
  0x74   : > { %463 = vmatprep.subr.bf16.mxu0 %v1480_v12  ;;  %1321 = vmatprep.subr.bf16.mxu1 %v1682_v1  ;;  %v515_v54 = vld [vmem:[%s1876_s17 + $0xa] sm:$0xff]  ;;  %v1331_v56 = vpack.c.bf16 %v766_v51, %v765_v50  ;;  %v767_v57 = vld [vmem:[#allocation5 + $0x60] sm:$0xff]  ;;  %v1507_v61 = vld [vmem:[#allocation2 + $0xd4] ss:$8 sps:$4 sm:$0xff]  }
  0x75   : > { %v768_v58 = vld [vmem:[#allocation5 + $0x68] sm:$0xff]  ;;  %v517_v59 = vpack.c.bf16 %v515_v54, %v514_v53  ;;  %v1505_v63 = vld [vmem:[#allocation2 + $0xd0] ss:$8 sps:$4 sm:$0xff]   ;;  %v1513_v6 = vld [vmem:[#allocation2 + $0xf4] ss:$8 sps:$4 sm:$0xff]  }
  0x76   : > { %1151 = vmatmul.mubr.msk.bf16.vlgmr.msra.gmra.mrb[0].mxu0 %vm359_vm0, %v309_v13  ;;  %v1502_v60 = vld [vmem:[#allocation2 + $0xc0] ss:$8 sps:$4 sm:$0xff]   ;;  %v1334_v62 = vpack.c.bf16 %v768_v58, %v767_v57  ;;  %v516_v2 = vld [vmem:[%s1876_s17 + $0x12] sm:$0xff]  ;;  %v1510_v3 = vld [vmem:[#allocation2 + $0xe4] ss:$8 sps:$4 sm:$0xff]  }
  0x77   : > { %464 = vmatpush1.bf16.msra.mxu0 %v1478_v14  ;;  %408 = vmatprep.mubr.bf16.mxu0 %v1681_v0  ;;  %v518_v4 = vpack.c.bf16 %v516_v2, %v516_v2  ;;  %v1508_v5 = vld [vmem:[#allocation2 + $0xe0] ss:$8 sps:$4 sm:$0xff]   ;;  %v1511_v7 = vld [vmem:[#allocation2 + $0xf0] ss:$8 sps:$4 sm:$0xff]  }
  0x78   : > { %465 = vmatprep.subr.bf16.mxu0 %v1483_v15  ;;  %1323 = vmatpush3.bf16.msra.mxu1 %v1322_v37  ;;  %v630_v8 = vld [vmem:[%s1876_s17 + $0x3] sm:$0xff]  ;;  %v631_v9 = vld [vmem:[%s1876_s17 + $0xb] sm:$0xff]  ;;  %v632_v11 = vld [vmem:[%s1876_s17 + $0x13] sm:$0xff]  ;;  %s1140_s17 = sshll.u32 %s284_s28, 3 }
  0x79   : > { %1324 = vmatprep.subr.bf16.mxu1 %v1682_v1  ;;  %v633_v10 = vpack.c.bf16 %v631_v9, %v630_v8  ;;  %v634_v12 = vpack.c.bf16 %v632_v11, %v632_v11  ;;  %v769_v13 = vld [vmem:[#allocation5 + $0x70] sm:$0xff]  ;;  %v770_v14 = vld [vmem:[#allocation5 + $0x78] sm:$0xff]  ;;  %v857_v51 = vld [vmem:[#allocation7] sm:$0xff]  ;;  %s286_s19 = scalar_lea.vmem [#allocation8], %s1140_s17 }
  0x7a   : > { %v1337_v15 = vpack.c.bf16 %v770_v14, %v769_v13  ;;  %v934_v53 = vld [vmem:[%s2028_s4 + $0x10] sm:$0xff]  ;;  %v935_v54 = vld [vmem:[%s2028_s4 + $0x18] sm:$0xff]  ;;  %v937_v57 = vld [vmem:[%s2028_s4 + $0x28] sm:$0xff]  ;;  %s1040_s20 = sshll.u32 %s286_s19, 4  ;;  %s1984_s20 = int_to_ptr.vmem [resolvable:$true] %s1040_s20 }
  0x7b   : > { %466 = vmatpush1.bf16.msra.mxu0 %v1481_v16  ;;  %v1684_v16 = vmov 0.0   ;;  %v946_v9 = vld [vmem:[%s2028_s4 + $0x70] sm:$0xff]  ;;  %v1184_v14 = vld [vmem:[%s2029_s5] ss:$0 sm:$0xff]  ;;  %s1604_s11 = scalar_lea.vmem %s1984_s20, 128  ;;  %p1611_p13 = scmp.lt.s32.totalorder %s1984_s20, %s1609_s14 }
  0x7c   : > { %467 = vmatprep.subr.bf16.mxu0 %v1486_v18  ;;  %1326 = vmatpush3.bf16.msra.mxu1 %v1325_v43  ;;  %p1605_p12 = scmp.ne.s32.totalorder %s1984_s20, %s1604_s11  ;;  %p1612_p1 = scmp.lt.s32.totalorder %s1610_s15, %s1604_s11 }
  0x7d   : > { %1327 = vmatprep.subr.bf16.mxu1 %v1682_v1  ;;  %1262 = vmatprep.mubr.msk.f32.mxu1 %vm1683_vm1, %v1684_v16 }
  0x7e   : > { %1152 = vmatmul.mubr.msk.bf16.gmra.mrb[4].mxu0 %vm359_vm0, %v310_v19  ;;  %p1606_p8 = pnand %p1605_p12, %p2047_p7  ;;  %p1613_p6 = por %p1612_p1, %p1611_p13 }
  0x7f   : > { %468 = vmatpush1.bf16.msra.mxu0 %v1484_v20  ;;  %495 = vmatprep.mubr.bf16.mxu0 %v1681_v0 }
  0x80   : > { %469 = vmatprep.subr.bf16.mxu0 %v1489_v21  ;;  %1329 = vmatpush3.bf16.msra.mxu1 %v1328_v49  ;;  %v933_v49 = vld [vmem:[%s2028_s4 + $0x8] sm:$0xff]  ;;  %p1607_p11 = pneg %p1606_p8 }
  0x81   : > { %1330 = vmatprep.subr.bf16.mxu1 %v1682_v1 }
  0x82   : > { %p1614_p9 = pnand %p1613_p6, %p1607_p11 }
  0x83   : > { %470 = vmatpush1.bf16.msra.mxu0 %v1487_v27 }
  0x84   : > { %573 = vmatprep.subr.bf16.mxu0 %v1492_v30  ;;  %1332 = vmatpush3.bf16.msra.mxu1 %v1331_v56  ;;  %v936_v56 = vld [vmem:[%s2028_s4 + $0x20] sm:$0xff] }
  0x85   : > { %1333 = vmatprep.subr.bf16.mxu1 %v1682_v1  ;;  %v1349_v58 = vpack.c.bf16 %v937_v57, %v936_v56 }
  0x86   : > { %1161 = vmatmul.mubr.msk.bf16.vlgmr.msra.gmra.mrb[0].mxu0 %vm359_vm0, %v296_v34 }
  0x87   : > { %574 = vmatpush1.bf16.msra.mxu0 %v1490_v35  ;;  %505 = vmatprep.mubr.bf16.mxu0 %v1681_v0 }
  0x88   : > { %575 = vmatprep.subr.bf16.mxu0 %v1495_v36  ;;  %1335 = vmatpush3.bf16.msra.mxu1 %v1334_v62  ;;  %v940_v62 = vld [vmem:[%s2028_s4 + $0x40] sm:$0xff] }
  0x89   : > { %1336 = vmatprep.subr.bf16.mxu1 %v1682_v1 }
  0x8b   : > { %576 = vmatpush1.bf16.msra.mxu0 %v1493_v40 }
  0x8c   : > { %577 = vmatprep.subr.bf16.mxu0 %v1498_v42  ;;  %1338 = vmatpush3.bf16.msra.mxu1 %v1337_v15 }
  0x8d   : > { %1339 = vmatprep.subr.bf16.mxu1 %v1682_v1 }
  0x8e   : > { %1162 = vmatmul.mubr.msk.bf16.gmra.mrb[4].mxu0 %vm359_vm0, %v297_v46 }
  0x8f   : > { %578 = vmatpush1.bf16.msra.mxu0 %v1496_v47  ;;  %605 = vmatprep.mubr.bf16.mxu0 %v1681_v0 }
  0x90   : > { %579 = vmatprep.subr.bf16.mxu0 %v1501_v48  ;;  %v932_v48 = vld [vmem:[%s2028_s4] sm:$0xff] }
  0x93   : > { %580 = vmatpush1.bf16.msra.mxu0 %v1499_v52  ;;  %v1343_v52 = vpack.c.bf16 %v933_v49, %v932_v48 }
  0x94   : > { %689 = vmatprep.subr.bf16.mxu0 %v1504_v55  ;;  %v1346_v55 = vpack.c.bf16 %v935_v54, %v934_v53 }
  0x96   : > { %1171 = vmatmul.mubr.msk.bf16.vlgmr.msra.gmra.mrb[0].mxu0 %vm359_vm0, %v517_v59  ;;  %v938_v59 = vld [vmem:[%s2028_s4 + $0x30] sm:$0xff] }
  0x97   : > { %690 = vmatpush1.bf16.msra.mxu0 %v1502_v60  ;;  %615 = vmatprep.mubr.bf16.mxu0 %v1681_v0  ;;  %v939_v60 = vld [vmem:[%s2028_s4 + $0x38] sm:$0xff] }
  0x98   : > { %691 = vmatprep.subr.bf16.mxu0 %v1507_v61  ;;  %v1352_v61 = vpack.c.bf16 %v939_v60, %v938_v59 }
  0x9b   : > { %692 = vmatpush1.bf16.msra.mxu0 %v1505_v63  ;;  %v941_v63 = vld [vmem:[%s2028_s4 + $0x48] sm:$0xff] }
  0x9c   : > { %693 = vmatprep.subr.bf16.mxu0 %v1510_v3  ;;  %v1355_v2 = vpack.c.bf16 %v941_v63, %v940_v62  ;;  %v942_v3 = vld [vmem:[%s2028_s4 + $0x50] sm:$0xff] }
  0x9e   : > { %1172 = vmatmul.mubr.msk.bf16.gmra.mrb[4].mxu0 %vm359_vm0, %v518_v4  ;;  %v943_v4 = vld [vmem:[%s2028_s4 + $0x58] sm:$0xff] }
  0x9f   : > { %694 = vmatpush1.bf16.msra.mxu0 %v1508_v5  ;;  %721 = vmatprep.mubr.bf16.mxu0 %v1681_v0  ;;  %v1358_v5 = vpack.c.bf16 %v943_v4, %v942_v3 }
  0xa0   : > { %695 = vmatprep.subr.bf16.mxu0 %v1513_v6  ;;  %v944_v6 = vld [vmem:[%s2028_s4 + $0x60] sm:$0xff] }
  0xa3   : > { %696 = vmatpush1.bf16.msra.mxu0 %v1511_v7  ;;  %v945_v7 = vld [vmem:[%s2028_s4 + $0x68] sm:$0xff] }
  0xa4   : > { %v1361_v8 = vpack.c.bf16 %v945_v7, %v944_v6 }
  0xa6   : > { %1181 = vmatmul.mubr.msk.bf16.vlgmr.msra.gmra.mrb[0].mxu0 %vm359_vm0, %v633_v10  ;;  %v947_v10 = vld [vmem:[%s2028_s4 + $0x78] sm:$0xff] }
  0xa7   : > { %731 = vmatprep.mubr.bf16.mxu0 %v1681_v0  ;;  %v1364_v11 = vpack.c.bf16 %v947_v10, %v946_v9 }
  0xae   : > { %1182 = vmatmul.mubr.msk.bf16.gmra.mrb[4].mxu0 %vm359_vm0, %v634_v12 }
 0x179   : > { %v723_v17 = vpop.f32.mrb[0].mxu0 }
 0x17a   : > { %v746_v18 = vmul.f32 %v723_v17, %v723_v17  ;;  %v725_v19 = vpop.f32.mrb[1].mxu0 }
 0x17b   : > { %v749_v20 = vmul.f32 %v725_v19, %v725_v19  ;;  %v727_v21 = vpop.f32.mrb[2].mxu0 }
 0x17c   : > { %v747_v0 = vmul.f32 %v727_v21, %v727_v21  ;;  %v729_v22 = vpop.f32.mrb[3].mxu0 }
 0x17d   : > { %v752_v23 = vadd.f32 %v749_v20, %v746_v18  ;;  %v750_v24 = vmul.f32 %v729_v22, %v729_v22 }
 0x17f   : > { %v753_v25 = vadd.f32 %v750_v24, %v747_v0  ;;  %1263 = vmatmul.mubr.f32.vlgmr.msra.gmra.mrb[0].mxu1 %v752_v23 }
 0x180   : > { %1265 = vmatprep.mubr.msk.f32.mxu1 %vm1683_vm1, %v1684_v16 }
 0x181   : > { %v733_v26 = vpop.f32.mrb[4].mxu0 }
 0x182   : > { %v748_v27 = vmul.f32 %v733_v26, %v733_v26  ;;  %v735_v28 = vpop.f32.mrb[5].mxu0 }
 0x183   : > { %v751_v29 = vmul.f32 %v735_v28, %v735_v28  ;;  %v737_v30 = vpop.f32.mrb[6].mxu0  ;;  %1266 = vmatmul.mubr.f32.gmra.mrb[2].mxu1 %v753_v25 }
 0x184   : > { %v738_v31 = vpop.f32.mrb[7].mxu0  ;;  %1268 = vmatprep.mubr.msk.f32.mxu1 %vm1683_vm1, %v1684_v16 }
 0x185   : > { %v754_v32 = vadd.f32 %v751_v29, %v748_v27 }
 0x187   : > { %1269 = vmatmul.mubr.f32.gmra.mrb[4].mxu1 %v754_v32 }
 0x188   : > { %1277 = vmatprep.mubr.msk.f32.mxu1 %vm1683_vm1, %v1684_v16 }
 0x252   : > { %v837_v33 = vpop.f32.mrb[0].mxu1 }
 0x253   : > { %v838_v34 = vadd.f32 1e-09, %v837_v33  ;;  %v1264_v35 = vpop.f32.mrb[1].mxu1 }
 0x255   : > { %1514 = vlog2.f32 %v838_v34 }
 0x256   : > { %v842_v36 = vpop.f32.mrb[2].mxu1 }
 0x257   : > { %v843_v37 = vadd.f32 1e-09, %v842_v36  ;;  %v1267_v38 = vpop.f32.mrb[3].mxu1 }
 0x259   : > { %1516 = vlog2.f32 %v843_v37 }
 0x25a   : > { %v847_v39 = vpop.f32.mrb[4].mxu1 }
 0x25b   : > { %v848_v40 = vadd.f32 1e-09, %v847_v39  ;;  %v1270_v41 = vpop.f32.mrb[5].mxu1 }
 0x25d   : > { %1518 = vlog2.f32 %v848_v40 }
 0x25f   : > { %v1515_v42 = vpop.eup %1514 }
 0x260   : > { %v852_v44 = vmul.f32 0.6931472, %v1515_v42 }
 0x263   : > { %v1517_v43 = vpop.eup %1516 }
 0x264   : > { %v854_v45 = vmul.f32 0.6931472, %v1517_v43 }
 0x266   : > { %v1340_v46 = vpack.c.bf16 %v854_v45, %v852_v44 }
 0x267   : > { %v1519_v47 = vpop.eup %1518 }
 0x268   : > { %1341 = vmatpush3.bf16.msra.mxu1 %v1340_v46  ;;  %v856_v50 = vmul.f32 0.6931472, %v1519_v47 }
 0x269   : > { %1275 = vmatprep.subr.mxu1 %v1684_v16 }
 0x26c   : > { %1276 = vmatpush3.msra.mxu1 %v856_v50 }
 0x26d   : > { %1278 = vmatmul.mubr.msk.f32.vlgmr.msra.gmra.mrb[6].mxu1 %vm858_vm2, %v857_v51  ;;  %1342 = vmatprep.subr.bf16.mxu1 %v1682_v1 }
 0x26e   : > { %1344 = vmatpush3.bf16.msra.mxu1 %v1343_v52  ;;  %1312 = vmatprep.mubr.msk.f32.mxu1 %vm1683_vm1, %v1684_v16 }
 0x26f   : > { %1345 = vmatprep.subr.bf16.mxu1 %v1682_v1 }
 0x272   : > { %1347 = vmatpush3.bf16.msra.mxu1 %v1346_v55 }
 0x273   : > { %1348 = vmatprep.subr.bf16.mxu1 %v1682_v1 }
 0x276   : > { %1350 = vmatpush3.bf16.msra.mxu1 %v1349_v58 }
 0x277   : > { %1351 = vmatprep.subr.bf16.mxu1 %v1682_v1 }
 0x27a   : > { %1353 = vmatpush3.bf16.msra.mxu1 %v1352_v61 }
 0x27b   : > { %1354 = vmatprep.subr.bf16.mxu1 %v1682_v1 }
 0x27e   : > { %1356 = vmatpush3.bf16.msra.mxu1 %v1355_v2 }
 0x27f   : > { %1357 = vmatprep.subr.bf16.mxu1 %v1682_v1 }
 0x282   : > { %1359 = vmatpush3.bf16.msra.mxu1 %v1358_v5 }
 0x283   : > { %1360 = vmatprep.subr.bf16.mxu1 %v1682_v1 }
 0x286   : > { %1362 = vmatpush3.bf16.msra.mxu1 %v1361_v8 }
 0x287   : > { %1363 = vmatprep.subr.bf16.mxu1 %v1682_v1 }
 0x28a   : > { %1365 = vmatpush3.bf16.msra.mxu1 %v1364_v11 }
 0x340   : > { %v928_v12 = vpop.f32.mrb[6].mxu1 }
 0x341   : > { %v1279_v13 = vpop.f32.mrb[7].mxu1  ;;  %1313 = vmatmul.mubr.f32.vlgmr.msra.gmra.mrb[8].mxu1 %v928_v12 }
 0x414   : > { %v1021_v15 = vpop.f32.mrb[8].mxu1 }
 0x415   : > { %v1022_v16 = vadd.f32 %v1184_v14, %v1021_v15  ;;  %v1314_v17 = vpop.f32.mrb[9].mxu1 }
 0x417   : > { %1025 = vst [vmem:[%s286_s19] sm:$0xff] %v1022_v16 }
 0x418   : > { %1617 = shalt.err (!%p1614_p9)
}
 0x419   : > { %s1618_s9 = scalar_lea.hbm %s1982_s10, 128  ;;  %s1622_s28 = scalar_lea.hbm %s2030_s6, 256 }
 0x41a   : > { %p1619_p2 = scmp.ne.s32.totalorder %s1982_s10, %s1618_s9  ;;  %p1623_p4 = scmp.lt.u32.totalorder %s1982_s10, %s2030_s6 }
 0x41b   : > { %p1624_p5 = scmp.lt.u32.totalorder %s1622_s28, %s1618_s9  ;;  %p1626_p12 = scmp.lt.u32.totalorder %s1618_s9, %s1982_s10 }
 0x41c   : > { %p1620_p3 = pnand %p1619_p2, %p2047_p7 }
 0x41d   : > { %p1625_p10 = por %p1624_p5, %p1623_p4 }
 0x41e   : > { %p1621_p0 = pneg %p1620_p3 }
 0x41f   : > { %p1627_p8 = por %p1626_p12, %p1625_p10 }
 0x421   : > { %p1628_p11 = pnand %p1627_p8, %p1621_p0 }
 0x423   : > { %1631 = shalt.err (!%p1628_p11)
}
 0x424   : > { %1402 = dma.vmem_to_hbm [thread:$0]  (%p2047_p7), %s1984_s20, 128, %s1982_s10, %s1027_s13  }
 0x425 PF: > { %p1424_p13 = scmp.ge.s32.totalorder %s1674_s24, 2  ;;  %s1052_s30 = sand.u32 1, %s1662_s21  }
 0x426   : > { %p2048_p1 = scmp.ne.s32.totalorder %s2038_s8, 0  ;;  %s1053_s18 = scalar_lea.sflag [#allocation4], %s1052_s30 }
 0x428   : > { %p1415_p6 = pnand %p1424_p13, %p2048_p1 }
 0x42a   : > { %1657 = dma.done.wait (!%p1415_p6), %s1053_s18, 128  }
 0x42b   : > { %1659 = vsyncadd (!%p1415_p6), %s1053_s18, 4294967168  ;;  %s2049_s19 = sld [smem:[#allocation12_spill]]  ;;  %s2050_s23 = sld [smem:[#allocation13_spill]] }
 0x42c   : > { %p18_p9 = scmp.ge.s32.totalorder %s1746_s27, 4   ;;  %s2051_s21 = smov %s1666_s22 }
 0x42d   : > { %s2053_s24 = smov %s1746_s27 }
 0x42e   :  { %20 = sbr.rel (!%p18_p9) target bundleno = 5 (0x5), region = 92 }
 0x431   : > { %s2052_s22 = smov %s2049_s19 }
 0x435   :  { %1058 = vsyncpa [#allocation3], 1 }
 0x436   :  { %1060 = vsyncpa [#allocation3 + $0x1], 1 }
 0x437   :  { %1061 = vsyncpa [#allocation6], 1 }
 0x438   :  { %1062 = vsyncpa [#allocation4], 1 }
 0x439   :  { %1064 = vsyncpa [#allocation4 + $0x1], 1 }

</bundles_post_ra>
